<compile_context>
chip_gen: v6e
topology: v6e:2x2x1
jax: 0.10.0
libtpu: 0.0.40
codegen_flags: <defaults>
</compile_context>

<pallas_src>
import jax
import jax.numpy as jnp
from jax.experimental import pallas as pl
from jax.experimental.pallas import tpu as pltpu

STATE_DIM = 4        # CartPole-v1 observation_space.shape[0]
ACTION_DIM = 2
HIDDEN = 128
OUT_PAD = 128        # fc3 MXU width (padded weight); only ACTION_DIM cols hit HBM
TILE_B_MAX = 2048    # batch tile cap (VMEM-safe on v5e/v6e/v7x)
SPLIT_MIN_TILE = 256 # if batch >= 2*this, force >=2 grid steps (v7x megacore)


def _round_up(n, m):
    return ((n + m - 1) // m) * m


def qnetwork_kernel(x_ref, w1_ref, b1_ref, w2_ref, b2_ref, w3_ref, b3_ref, o_ref):
    x = x_ref[...]        # (tile_b, 4)   f32
    w1 = w1_ref[...]      # (4, 128)      f32

    # fc1 + relu: K=4 contraction as 4 broadcast FMAs on the VPU
    # (avoids padding x to 128 lanes and a mostly-zero MXU dot).
    h1 = b1_ref[...] + x[:, 0:1] * w1[0:1, :]
    for d in range(1, STATE_DIM):
        h1 = h1 + x[:, d:d + 1] * w1[d:d + 1, :]
    h1 = jnp.maximum(h1, 0.0)

    # fc2 + relu: bf16 MXU operands, f32 accumulation, f32 elementwise.
    h2 = jnp.dot(h1.astype(jnp.bfloat16), w2_ref[...],
                 preferred_element_type=jnp.float32)
    h2 = jnp.maximum(h2 + b2_ref[...], 0.0)

    # fc3 (no activation): compute at full 128-wide N for the MXU, but store
    # only the ACTION_DIM true columns (narrow output -> 64x less HBM writeback).
    out = jnp.dot(h2.astype(jnp.bfloat16), w3_ref[...],
                  preferred_element_type=jnp.float32)
    o_ref[...] = (out[:, :ACTION_DIM] + b3_ref[...]).astype(o_ref.dtype)


def prepare_params(params):
    """One-time packing of raw f32 params for the kernel:
    pad fc3 weight to a 128-wide MXU-friendly N, cast MXU weights to bf16,
    normalize bias shapes to (1, N)."""
    w1, b1, w2, b2, w3, b3 = params

    def bias2d(b, n):
        b = jnp.asarray(b, jnp.float32).reshape(1, -1)
        assert b.shape == (1, n), f"bias shape {b.shape}, expected (1, {n})"
        return b

    assert w1.shape == (STATE_DIM, HIDDEN)
    assert w2.shape == (HIDDEN, HIDDEN)
    assert w3.shape == (HIDDEN, ACTION_DIM)

    w3p = jnp.pad(w3, ((0, 0), (0, OUT_PAD - ACTION_DIM)))
    return (w1.astype(jnp.float32),
            bias2d(b1, HIDDEN),
            w2.astype(jnp.bfloat16),
            bias2d(b2, HIDDEN),
            w3p.astype(jnp.bfloat16),
            bias2d(b3, ACTION_DIM))


def _choose_tiling(B):
    """Pick (tile_b, b_pad, n_steps). Keeps >=2 even grid steps at large batch
    so the 'parallel' axis shards across both v7x TensorCores."""
    b8 = _round_up(B, 8)
    n_steps = max(1, -(-b8 // TILE_B_MAX))
    if n_steps == 1 and b8 >= 2 * SPLIT_MIN_TILE:
        n_steps = 2
    tile_b = _round_up(-(-b8 // n_steps), 8)
    b_pad = n_steps * tile_b
    return tile_b, b_pad, n_steps


def qnetwork_forward(x, prepared_params):
    """x: (B, STATE_DIM) float32. prepared_params from prepare_params().
    Returns (B, ACTION_DIM) Q-values (float32)."""
    w1, b1, w2, b2, w3p, b3 = prepared_params
    B = x.shape[0]

    tile_b, b_pad, n_steps = _choose_tiling(B)
    if b_pad != B:
        # Only taken for ragged batch sizes; typical DQN batches (mult. of 8,
        # <= TILE_B_MAX) hit the no-copy path.
        x = jnp.pad(x, ((0, b_pad - B), (0, 0)))

    const = lambda i: (0, 0)

    out = pl.pallas_call(
        qnetwork_kernel,
        out_shape=jax.ShapeDtypeStruct((b_pad, ACTION_DIM), jnp.float32),
        grid=(n_steps,),
        in_specs=[
            pl.BlockSpec((tile_b, STATE_DIM), lambda i: (i, 0)),  # x (batch-tiled)
            pl.BlockSpec((STATE_DIM, HIDDEN), const),             # w1 (VMEM-resident)
            pl.BlockSpec((1, HIDDEN), const),                     # b1
            pl.BlockSpec((HIDDEN, HIDDEN), const),                # w2 (bf16)
            pl.BlockSpec((1, HIDDEN), const),                     # b2
            pl.BlockSpec((HIDDEN, OUT_PAD), const),               # w3 (padded, bf16)
            pl.BlockSpec((1, ACTION_DIM), const),                 # b3 (true width)
        ],
        out_specs=pl.BlockSpec((tile_b, ACTION_DIM), lambda i: (i, 0)),
        compiler_params=pltpu.CompilerParams(
            dimension_semantics=("parallel",)),
    )(x, w1, b1, w2, b2, w3p, b3)

    # Only trims rows added for grid alignment (columns already narrow).
    return out[:B, :]


def init_params(key):
    """Deterministic init mimicking PyTorch nn.Linear defaults:
    U(-1/sqrt(fan_in), +1/sqrt(fan_in)); weights stored as (in, out)."""
    ks = jax.random.split(key, 6)

    def linear(kw, kb, fan_in, fan_out):
        bound = 1.0 / jnp.sqrt(fan_in)
        w = jax.random.uniform(kw, (fan_in, fan_out), jnp.float32, -bound, bound)
        b = jax.random.uniform(kb, (1, fan_out), jnp.float32, -bound, bound)
        return w, b

    w1, b1 = linear(ks[0], ks[1], STATE_DIM, HIDDEN)
    w2, b2 = linear(ks[2], ks[3], HIDDEN, HIDDEN)
    w3, b3 = linear(ks[4], ks[5], HIDDEN, ACTION_DIM)
    return (w1, b1, w2, b2, w3, b3)


if __name__ == "__main__":
    key = jax.random.PRNGKey(0)
    pkey, xkey = jax.random.split(key)
    params = init_params(pkey)
    prepared = prepare_params(params)   # cached once; no per-call weight packing

    batch = 8
    x = jax.random.normal(xkey, (batch, STATE_DIM), jnp.float32)

    fwd = jax.jit(qnetwork_forward)
    q_values = fwd(x, prepared)
    jax.block_until_ready(q_values)

    # Pure-JAX f32 reference (same math as the PyTorch forward).
    w1, b1, w2, b2, w3, b3 = params
    h = jnp.maximum(x @ w1 + b1, 0.0)
    h = jnp.maximum(h @ w2 + b2, 0.0)
    ref = h @ w3 + b3

    assert q_values.shape == (batch, ACTION_DIM)
    # Tolerance loosened vs the f32 reference because fc2/fc3 use bf16 MXU operands.
    assert jnp.allclose(q_values, ref, atol=1e-2, rtol=1e-2), \
        float(jnp.max(jnp.abs(q_values - ref)))

    print("KERNEL_OK")
</pallas_src>

<mosaic_0001>
module attributes {stable_mosaic.version = 11 : i64} {
  func.func @qnetwork_kernel(%arg0: i32, %arg1: memref<8x4xf32, #tpu.memory_space<vmem>>, %arg2: memref<4x128xf32, #tpu.memory_space<vmem>>, %arg3: memref<1x128xf32, #tpu.memory_space<vmem>>, %arg4: memref<128x128xbf16, #tpu.memory_space<vmem>>, %arg5: memref<1x128xf32, #tpu.memory_space<vmem>>, %arg6: memref<128x128xbf16, #tpu.memory_space<vmem>>, %arg7: memref<1x2xf32, #tpu.memory_space<vmem>>, %arg8: memref<8x2xf32, #tpu.memory_space<vmem>>) attributes {dimension_semantics = [#tpu.dimension_semantics<parallel>], iteration_bounds = array<i64: 1>, scalar_prefetch = 0 : i64, scratch_operands = 0 : i64, tpu.core_type = #tpu.core_type<tc>, window_params = [{transform_indices = @transform_0, window_bounds = array<i64: 8, 4>}, {pipeline_mode = #tpu.pipeline_mode<synchronous>, transform_indices = @transform_1, window_bounds = array<i64: 4, 128>}, {pipeline_mode = #tpu.pipeline_mode<synchronous>, transform_indices = @transform_2, window_bounds = array<i64: 1, 128>}, {pipeline_mode = #tpu.pipeline_mode<synchronous>, transform_indices = @transform_3, window_bounds = array<i64: 128, 128>}, {pipeline_mode = #tpu.pipeline_mode<synchronous>, transform_indices = @transform_4, window_bounds = array<i64: 1, 128>}, {pipeline_mode = #tpu.pipeline_mode<synchronous>, transform_indices = @transform_5, window_bounds = array<i64: 128, 128>}, {pipeline_mode = #tpu.pipeline_mode<synchronous>, transform_indices = @transform_6, window_bounds = array<i64: 1, 2>}, {transform_indices = @transform_7, window_bounds = array<i64: 8, 2>}]} {
    %c0 = arith.constant 0 : index
    %c0_0 = arith.constant 0 : index
    %0 = vector.load %arg1[%c0, %c0_0] : memref<8x4xf32, #tpu.memory_space<vmem>>, vector<8x4xf32>
    %c0_1 = arith.constant 0 : index
    %c0_2 = arith.constant 0 : index
    %1 = vector.load %arg2[%c0_1, %c0_2] : memref<4x128xf32, #tpu.memory_space<vmem>>, vector<4x128xf32>
    %c0_3 = arith.constant 0 : index
    %c0_4 = arith.constant 0 : index
    %2 = vector.load %arg3[%c0_3, %c0_4] : memref<1x128xf32, #tpu.memory_space<vmem>>, vector<1x128xf32>
    %3 = vector.extract_strided_slice %0 {offsets = [0, 0], sizes = [8, 1], strides = [1, 1]} : vector<8x4xf32> to vector<8x1xf32>
    %4 = vector.extract_strided_slice %1 {offsets = [0, 0], sizes = [1, 128], strides = [1, 1]} : vector<4x128xf32> to vector<1x128xf32>
    %5 = vector.broadcast %3 : vector<8x1xf32> to vector<8x128xf32>
    %6 = vector.broadcast %4 : vector<1x128xf32> to vector<8x128xf32>
    %7 = arith.mulf %5, %6 : vector<8x128xf32>
    %8 = vector.broadcast %2 : vector<1x128xf32> to vector<8x128xf32>
    %9 = arith.addf %8, %7 : vector<8x128xf32>
    %10 = vector.extract_strided_slice %0 {offsets = [0, 1], sizes = [8, 1], strides = [1, 1]} : vector<8x4xf32> to vector<8x1xf32>
    %11 = vector.extract_strided_slice %1 {offsets = [1, 0], sizes = [1, 128], strides = [1, 1]} : vector<4x128xf32> to vector<1x128xf32>
    %12 = vector.broadcast %10 : vector<8x1xf32> to vector<8x128xf32>
    %13 = vector.broadcast %11 : vector<1x128xf32> to vector<8x128xf32>
    %14 = arith.mulf %12, %13 : vector<8x128xf32>
    %15 = arith.addf %9, %14 : vector<8x128xf32>
    %16 = vector.extract_strided_slice %0 {offsets = [0, 2], sizes = [8, 1], strides = [1, 1]} : vector<8x4xf32> to vector<8x1xf32>
    %17 = vector.extract_strided_slice %1 {offsets = [2, 0], sizes = [1, 128], strides = [1, 1]} : vector<4x128xf32> to vector<1x128xf32>
    %18 = vector.broadcast %16 : vector<8x1xf32> to vector<8x128xf32>
    %19 = vector.broadcast %17 : vector<1x128xf32> to vector<8x128xf32>
    %20 = arith.mulf %18, %19 : vector<8x128xf32>
    %21 = arith.addf %15, %20 : vector<8x128xf32>
    %22 = vector.extract_strided_slice %0 {offsets = [0, 3], sizes = [8, 1], strides = [1, 1]} : vector<8x4xf32> to vector<8x1xf32>
    %23 = vector.extract_strided_slice %1 {offsets = [3, 0], sizes = [1, 128], strides = [1, 1]} : vector<4x128xf32> to vector<1x128xf32>
    %24 = vector.broadcast %22 : vector<8x1xf32> to vector<8x128xf32>
    %25 = vector.broadcast %23 : vector<1x128xf32> to vector<8x128xf32>
    %26 = arith.mulf %24, %25 : vector<8x128xf32>
    %27 = arith.addf %21, %26 : vector<8x128xf32>
    %cst = arith.constant 0.000000e+00 : f32
    %28 = vector.broadcast %cst : f32 to vector<8x128xf32>
    %29 = arith.maximumf %27, %28 : vector<8x128xf32>
    %30 = arith.truncf %29 : vector<8x128xf32> to vector<8x128xbf16>
    %c0_5 = arith.constant 0 : index
    %c0_6 = arith.constant 0 : index
    %31 = vector.load %arg4[%c0_5, %c0_6] : memref<128x128xbf16, #tpu.memory_space<vmem>>, vector<128x128xbf16>
    %cst_7 = arith.constant dense<0.000000e+00> : vector<8x128xf32>
    %32 = tpu.matmul %30, %31, %cst_7 {dimension_numbers = #tpu.dot_dimension_numbers<[1], [0], [0], [1], [0, 0, 1, 1], [], []>} : vector<8x128xbf16>, vector<128x128xbf16>, vector<8x128xf32> -> vector<8x128xf32>
    %c0_8 = arith.constant 0 : index
    %c0_9 = arith.constant 0 : index
    %33 = vector.load %arg5[%c0_8, %c0_9] : memref<1x128xf32, #tpu.memory_space<vmem>>, vector<1x128xf32>
    %34 = vector.broadcast %33 : vector<1x128xf32> to vector<8x128xf32>
    %35 = arith.addf %32, %34 : vector<8x128xf32>
    %cst_10 = arith.constant 0.000000e+00 : f32
    %36 = vector.broadcast %cst_10 : f32 to vector<8x128xf32>
    %37 = arith.maximumf %35, %36 : vector<8x128xf32>
    %38 = arith.truncf %37 : vector<8x128xf32> to vector<8x128xbf16>
    %c0_11 = arith.constant 0 : index
    %c0_12 = arith.constant 0 : index
    %39 = vector.load %arg6[%c0_11, %c0_12] : memref<128x128xbf16, #tpu.memory_space<vmem>>, vector<128x128xbf16>
    %cst_13 = arith.constant dense<0.000000e+00> : vector<8x128xf32>
    %40 = tpu.matmul %38, %39, %cst_13 {dimension_numbers = #tpu.dot_dimension_numbers<[1], [0], [0], [1], [0, 0, 1, 1], [], []>} : vector<8x128xbf16>, vector<128x128xbf16>, vector<8x128xf32> -> vector<8x128xf32>
    %41 = vector.extract_strided_slice %40 {offsets = [0, 0], sizes = [8, 2], strides = [1, 1]} : vector<8x128xf32> to vector<8x2xf32>
    %c0_14 = arith.constant 0 : index
    %c0_15 = arith.constant 0 : index
    %42 = vector.load %arg7[%c0_14, %c0_15] : memref<1x2xf32, #tpu.memory_space<vmem>>, vector<1x2xf32>
    %43 = vector.broadcast %42 : vector<1x2xf32> to vector<8x2xf32>
    %44 = arith.addf %41, %43 : vector<8x2xf32>
    %c0_16 = arith.constant 0 : index
    %c0_17 = arith.constant 0 : index
    %45 = vector.load %arg8[%c0_16, %c0_17] : memref<8x2xf32, #tpu.memory_space<vmem>>, vector<8x2xf32>
    tpu.vector_store %arg8[%c0_16, %c0_17], %44 {strides = array<i32>} : memref<8x2xf32, #tpu.memory_space<vmem>>, vector<8x2xf32>,
    return
  }
  func.func @transform_0(%arg0: i32) -> (i32, i32) {
    %c0_i32 = arith.constant 0 : i32
    %c0_i32_0 = arith.constant 0 : i32
    return %arg0, %c0_i32 : i32, i32
  }
  func.func @transform_1(%arg0: i32) -> (i32, i32) {
    %c0_i32 = arith.constant 0 : i32
    %c0_i32_0 = arith.constant 0 : i32
    %c0_i32_1 = arith.constant 0 : i32
    return %c0_i32, %c0_i32_0 : i32, i32
  }
  func.func @transform_2(%arg0: i32) -> (i32, i32) {
    %c0_i32 = arith.constant 0 : i32
    %c0_i32_0 = arith.constant 0 : i32
    %c0_i32_1 = arith.constant 0 : i32
    return %c0_i32, %c0_i32_0 : i32, i32
  }
  func.func @transform_3(%arg0: i32) -> (i32, i32) {
    %c0_i32 = arith.constant 0 : i32
    %c0_i32_0 = arith.constant 0 : i32
    %c0_i32_1 = arith.constant 0 : i32
    return %c0_i32, %c0_i32_0 : i32, i32
  }
  func.func @transform_4(%arg0: i32) -> (i32, i32) {
    %c0_i32 = arith.constant 0 : i32
    %c0_i32_0 = arith.constant 0 : i32
    %c0_i32_1 = arith.constant 0 : i32
    return %c0_i32, %c0_i32_0 : i32, i32
  }
  func.func @transform_5(%arg0: i32) -> (i32, i32) {
    %c0_i32 = arith.constant 0 : i32
    %c0_i32_0 = arith.constant 0 : i32
    %c0_i32_1 = arith.constant 0 : i32
    return %c0_i32, %c0_i32_0 : i32, i32
  }
  func.func @transform_6(%arg0: i32) -> (i32, i32) {
    %c0_i32 = arith.constant 0 : i32
    %c0_i32_0 = arith.constant 0 : i32
    %c0_i32_1 = arith.constant 0 : i32
    return %c0_i32, %c0_i32_0 : i32, i32
  }
  func.func @transform_7(%arg0: i32) -> (i32, i32) {
    %c0_i32 = arith.constant 0 : i32
    %c0_i32_0 = arith.constant 0 : i32
    return %arg0, %c0_i32 : i32, i32
  }
}

</mosaic_0001>

<bundles_post_ra>
// kernel: qnetwork_forward.1
= control target key start
LH: loop header
LB: loop body
LE: loop exit
PB: predicated region body
PF: predicated region fallthrough
CT: control target
= control target key end

     0   :  { %12 = vsyncpa [#allocation3], 0  ;;  %s584_s0 = inlined_call_operand.vmem [shape: f32[8,4], index: 0, kind: input, shape index: {}]   ;;  %s585_s1 = inlined_call_operand.vmem [shape: f32[4,128], index: 1, kind: input, shape index: {}]   ;;  %s586_s2 = inlined_call_operand.vmem [shape: f32[1,128], index: 2, kind: input, shape index: {}]   ;;  %s587_s3 = inlined_call_operand.hbm [shape: bf16[128,128], index: 3, kind: input, shape index: {}]   ;;  %s588_s4 = inlined_call_operand.vmem [shape: f32[1,128], index: 4, kind: input, shape index: {}]   ;;  %s589_s5 = inlined_call_operand.hbm [shape: bf16[128,128], index: 5, kind: input, shape index: {}]   ;;  %s590_s6 = inlined_call_operand.vmem [shape: f32[1,2], index: 6, kind: input, shape index: {}]   ;;  %s591_s7 = inlined_call_operand.vmem [shape: f32[8,2], index: 7, kind: output, shape index: {}]  }
   0x1   :  { %13 = vsyncpa [#allocation5], 0  ;;  %s492_s24 = smov [#allocation2]  }
   0x2   :  { %s25_s25 = sshll.u32 %s492_s24, 4  ;;  %s26_s25 = int_to_ptr.vmem [resolvable:$true] %s25_s25 }
   0x3   :  { %s456_s26 = scalar_lea.vmem %s26_s25, 1024  ;;  %p461_p1 = scmp.lt.s32.totalorder %s26_s25, %s26_s25 }
   0x4   :  { %p457_p0 = scmp.ne.s32.totalorder %s26_s25, %s456_s26  ;;  %p462_p2 = scmp.lt.s32.totalorder %s456_s26, %s456_s26 }
   0x6   :  { %p463_p3 = por %p462_p2, %p461_p1 }
   0x8   :  { %p464_p4 = pnand %p463_p3, %p457_p0 }
   0xa   :  { %467 = shalt.err (!%p464_p4)
}
   0xb   :  { %s493_s27 = smov 64   ;;  %s494_s28 = smov 4  }
   0xc   :  { %31 = dma.hbm_to_vmem [thread:$0]  %s587_s3, 1024, %s26_s25, [#allocation3], %s493_s27, %s493_s27, %s494_s28  }
   0xd   :  { %s495_s8 = smov [#allocation4]  }
   0xe   :  { %s39_s9 = sshll.u32 %s495_s8, 4  ;;  %s40_s9 = int_to_ptr.vmem [resolvable:$true] %s39_s9 }
   0xf   :  { %s476_s10 = scalar_lea.vmem %s40_s9, 1024  ;;  %p481_p6 = scmp.lt.s32.totalorder %s40_s9, %s40_s9 }
  0x10   :  { %p477_p5 = scmp.ne.s32.totalorder %s40_s9, %s476_s10  ;;  %p482_p7 = scmp.lt.s32.totalorder %s476_s10, %s476_s10 }
  0x12   :  { %p483_p8 = por %p482_p7, %p481_p6 }
  0x14   :  { %p484_p9 = pnand %p483_p8, %p477_p5 }
  0x16   :  { %487 = shalt.err (!%p484_p9)
}
  0x17   :  { %45 = dma.hbm_to_vmem [thread:$0]  %s589_s5, 1024, %s40_s9, [#allocation5], %s493_s27, %s493_s27, %s494_s28  }
  0x18   :  { %488 = dma.done.wait [#allocation3], 1024  }
  0x19   :  { %489 = vsyncadd [#allocation3], 4294966272 }
  0x1a   :  { %490 = dma.done.wait [#allocation5], 1024  }
  0x1b   :  { %491 = vsyncadd [#allocation5], 4294966272  ;;  %v496_v0 = vmov 0   ;;  %v497_v1 = vmov 2   ;;  %v498_v2 = vmov 0.0   ;;  %v55_v3 = vld [vmem:[%s584_s0] sm:$0xff]  ;;  %v63_v20 = vlaneseq }
  0x1c   :  { %427 = vset.pattern.permute.xlu0 %v496_v0  ;;  %429 = vset.pattern.permute.xlu1 %v497_v1  ;;  %v432_v4 = vld [vmem:[#allocation2 + $0x38] sm:$0xff]   ;;  %v433_v5 = vld [vmem:[#allocation2 + $0x30] sm:$0xff]   ;;  %v499_v6 = vmov 1   ;;  %v500_v7 = vmov 3   ;;  %v434_v8 = vld [vmem:[#allocation2 + $0x28] sm:$0xff]   ;;  %vm501_vm0 = vmmov 0  }
  0x1d   :  { %377 = vmatprep.subr.bf16.mxu0 %v498_v2  ;;  %397 = vmatprep.subr.bf16.mxu1 %v498_v2  ;;  %v435_v9 = vld [vmem:[#allocation2 + $0x20] sm:$0xff]   ;;  %v440_v10 = vld [vmem:[#allocation4 + $0x38] sm:$0xff]   ;;  %v441_v12 = vld [vmem:[#allocation4 + $0x30] sm:$0xff]   ;;  %v64_v21 = vshrl.u32 %v63_v20, 7  ;;  %vm332_vm1 = vcmask 15360  }
  0x1e   :  { %60 = vperm.xlu0 %427, %v55_v3   ;;  %86 = vperm.xlu1 %429, %v55_v3   ;;  %v436_v11 = vld [vmem:[#allocation2 + $0x18] sm:$0xff]   ;;  %v437_v13 = vld [vmem:[#allocation2 + $0x10] sm:$0xff]   ;;  %v442_v14 = vld [vmem:[#allocation4 + $0x28] sm:$0xff]  }
  0x1f   :  { %378 = vmatpush3.bf16.msra.mxu0 %v432_v4  ;;  %393 = vmatprep.mubr.msk.bf16.mxu0 %vm501_vm0, %v498_v2  ;;  %v438_v15 = vld [vmem:[#allocation2 + $0x8] sm:$0xff]   ;;  %v443_v16 = vld [vmem:[#allocation4 + $0x20] sm:$0xff]   ;;  %v444_v18 = vld [vmem:[#allocation4 + $0x18] sm:$0xff]   ;;  %v65_v22 = vsub.s32 0, %v64_v21  ;;  %v81_v25 = vsub.s32 1, %v64_v21  ;;  %v91_v27 = vsub.s32 2, %v64_v21 }
  0x20   :  { %379 = vmatprep.subr.bf16.mxu0 %v498_v2  ;;  %413 = vmatprep.mubr.msk.bf16.mxu1 %vm501_vm0, %v498_v2  ;;  %v439_v17 = vld [vmem:[#allocation2] sm:$0xff]   ;;  %v445_v19 = vld [vmem:[#allocation4 + $0x10] sm:$0xff]   ;;  %v101_v29 = vsub.s32 3, %v64_v21  ;;  %v446_v46 = vld [vmem:[#allocation4 + $0x8] sm:$0xff]  }
  0x21   :  { %398 = vmatpush3.bf16.msra.mxu1 %v440_v10  ;;  %v56_v23 = vld [vmem:[%s585_s1] sm:$0xf] }
  0x22   :  { %428 = vset.pattern.permute.xlu0 %v499_v6  ;;  %430 = vset.pattern.permute.xlu1 %v500_v7  ;;  %v66_v24 = vrot.slane %v56_v23, %v65_v22  ;;  %v82_v31 = vrot.slane %v56_v23, %v81_v25  ;;  %v340_v32 = vld [vmem:[%s586_s2] ss:$0 sm:$0xff]  ;;  %v92_v33 = vrot.slane %v56_v23, %v91_v27 }
  0x23   :  { %76 = vperm.xlu0 %428, %v55_v3   ;;  %96 = vperm.xlu1 %430, %v55_v3   ;;  %v102_v34 = vrot.slane %v56_v23, %v101_v29  ;;  %v447_v47 = vld [vmem:[#allocation4] sm:$0xff]  }
  0x24   :  { %380 = vmatpush3.bf16.msra.mxu0 %v433_v5  ;;  %399 = vmatprep.subr.bf16.mxu1 %v498_v2  ;;  %v341_v48 = vld [vmem:[%s588_s4] ss:$0 sm:$0xff] }
  0x25   :  { %381 = vmatprep.subr.bf16.mxu0 %v498_v2  ;;  %400 = vmatpush3.bf16.msra.mxu1 %v441_v12  ;;  %v358_v56 = vld [vmem:[%s590_s6] ss:$0 sm:$0xff] }
  0x26   :  { %401 = vmatprep.subr.bf16.mxu1 %v498_v2 }
  0x27   :  { %431 = vset.pattern.permute.xlu0 %v500_v7 }
  0x28   :  { %382 = vmatpush3.bf16.msra.mxu0 %v434_v8 }
  0x29   :  { %383 = vmatprep.subr.bf16.mxu0 %v498_v2  ;;  %402 = vmatpush3.bf16.msra.mxu1 %v442_v14 }
  0x2a   :  { %403 = vmatprep.subr.bf16.mxu1 %v498_v2 }
  0x2c   :  { %384 = vmatpush3.bf16.msra.mxu0 %v435_v9 }
  0x2d   :  { %385 = vmatprep.subr.bf16.mxu0 %v498_v2  ;;  %404 = vmatpush3.bf16.msra.mxu1 %v443_v16 }
  0x2e   :  { %405 = vmatprep.subr.bf16.mxu1 %v498_v2 }
  0x30   :  { %386 = vmatpush3.bf16.msra.mxu0 %v436_v11 }
  0x31   :  { %387 = vmatprep.subr.bf16.mxu0 %v498_v2  ;;  %406 = vmatpush3.bf16.msra.mxu1 %v444_v18 }
  0x32   :  { %407 = vmatprep.subr.bf16.mxu1 %v498_v2 }
  0x34   :  { %388 = vmatpush3.bf16.msra.mxu0 %v437_v13 }
  0x35   :  { %389 = vmatprep.subr.bf16.mxu0 %v498_v2  ;;  %408 = vmatpush3.bf16.msra.mxu1 %v445_v19 }
  0x36   :  { %409 = vmatprep.subr.bf16.mxu1 %v498_v2 }
  0x38   :  { %390 = vmatpush3.bf16.msra.mxu0 %v438_v15 }
  0x39   :  { %391 = vmatprep.subr.bf16.mxu0 %v498_v2  ;;  %410 = vmatpush3.bf16.msra.mxu1 %v446_v46 }
  0x3a   :  { %411 = vmatprep.subr.bf16.mxu1 %v498_v2 }
  0x3c   :  { %392 = vmatpush3.bf16.msra.mxu0 %v439_v17 }
  0x3d   :  { %412 = vmatpush3.bf16.msra.mxu1 %v447_v47 }
  0x99   :  { %v61_v26 = vpop.permute.xlu0 %60  ;;  %v87_v28 = vpop.permute.xlu1 %86 }
  0x9a   :  { %v67_v30 = vmul.f32 %v66_v24, %v61_v26  ;;  %v93_v39 = vmul.f32 %v92_v33, %v87_v28 }
  0x9c   :  { %v74_v37 = vadd.f32 %v340_v32, %v67_v30 }
  0x9e   :  { %v77_v35 = vpop.permute.xlu0 %76  ;;  %v97_v36 = vpop.permute.xlu1 %96 }
  0x9f   :  { %v83_v38 = vmul.f32 %v82_v31, %v77_v35  ;;  %v103_v41 = vmul.f32 %v102_v34, %v97_v36 }
  0xa1   :  { %v84_v40 = vadd.f32 %v83_v38, %v74_v37 }
  0xa3   :  { %v94_v42 = vadd.f32 %v93_v39, %v84_v40 }
  0xa5   :  { %v104_v43 = vadd.f32 %v103_v41, %v94_v42 }
  0xa7   :  { %v105_v44 = vmax.f32 %v104_v43, 0.0 }
  0xa9   :  { %v106_v45 = vpack.c.bf16 %v105_v44, %v105_v44 }
  0xab   :  { %394 = vmatmul.mubr.bf16.vlgmr.msra.gmra.mxu0 %v106_v45 }
 0x16b   :  { %v212_v49 = vpop.f32.mrf.mxu0 }
 0x16c   :  { %v213_v50 = vadd.f32 %v341_v48, %v212_v49 }
 0x16d   :  { %v395_v51 = vpop.f32.mrf.mxu0 }
 0x16e   :  { %v218_v52 = vmax.f32 %v213_v50, 0.0 }
 0x16f   :  { %v215_v53 = vpop.f32.mrf.mxu0 }
 0x170   :  { %v219_v54 = vpack.c.bf16 %v218_v52, %v218_v52 }
 0x171   :  { %v396_v55 = vpop.f32.mrf.mxu0 }
 0x172   :  { %414 = vmatmul.mubr.bf16.vlgmr.msra.gmra.mxu1 %v219_v54 }
 0x232   :  { %v318_v57 = vpop.f32.mrf.mxu1 }
 0x233   :  { %v331_v58 = vadd.f32 %v358_v56, %v318_v57 }
 0x234   :  { %v415_v59 = vpop.f32.mrf.mxu1 }
 0x235   :  { %333 = vst.msk [vmem:[%s591_s7] sm:$0xff] %vm332_vm1, %v331_v58 }
 0x236   :  { %v321_v60 = vpop.f32.mrf.mxu1 }
 0x238   :  { %v416_v61 = vpop.f32.mrf.mxu1 }
 0x239   :  { %338 = vsyncpa [#allocation3], 1 }
 0x23a   :  { %339 = vsyncpa [#allocation5], 1 }

</bundles_post_ra>
